<compile_context>
chip_gen: v7x
topology: tpu7x:2x2x1
jax: 0.10.0
libtpu: 0.0.40
codegen_flags: <defaults>
</compile_context>

<pallas_src>
from functools import partial

import jax
import jax.numpy as jnp
from jax.experimental import pallas as pl
from jax.experimental.pallas import tpu as pltpu


def _normalize_kernel(scale_ref, bias_ref, img_ref, out_ref):
    # scale_ref / bias_ref: (TR, 1) per-row channel constants in f32 (VMEM).
    # img_ref  / out_ref:   (TR, TC) lane-dense tiles of the flattened image.
    # (img - mean) / std  ==  img * (1/std) + (-mean/std)
    x = img_ref[...].astype(jnp.float32)
    y = x * scale_ref[...] + bias_ref[...]
    out_ref[...] = y.astype(out_ref.dtype)


def _sublane_quantum(itemsize):
    # Sub-32-bit dtypes pack along sublanes: f32 -> 8, bf16 -> 16, i8/fp8 -> 32.
    return max(8, (4 // max(int(itemsize), 1)) * 8)


def _choose_tiles(n_rows, n_cols, itemsize, target_bytes):
    sub = _sublane_quantum(itemsize)

    # Column tile: full width if it fits the byte budget (always a legal block
    # because it equals the array dim); otherwise a large multiple of 128.
    if n_cols * itemsize <= target_bytes:
        tc = n_cols
    else:
        tc = min(n_cols, max(128, ((target_bytes // itemsize) // 128) * 128))

    # Row tile: fill the byte budget, keeping the second-minor dim a multiple
    # of the packed sublane quantum (or the full row count).
    tr = max(1, target_bytes // (tc * itemsize))
    if tr >= n_rows:
        tr = n_rows
    elif tr >= sub:
        tr = (tr // sub) * sub
    else:
        # Even `sub` rows of the chosen tc exceed the budget: force minimal
        # rows and shrink the column tile so the block stays within budget
        # (previously this path could emit 16 MiB blocks -> VMEM blow-up).
        tr = min(sub, n_rows)
        tc_budget = ((target_bytes // (tr * itemsize)) // 128) * 128
        tc = max(128, min(tc, tc_budget))
    return tr, tc


def _maybe_split_for_megacore(tr, tc, n_rows, n_cols, itemsize):
    # v7x has 2 TensorCores; a single-step grid pins the stream to one TC.
    # Force >= 2 blocks along a "parallel" axis when it is legal to do so.
    sub = _sublane_quantum(itemsize)
    if pl.cdiv(n_rows, tr) * pl.cdiv(n_cols, tc) >= 2:
        return tr, tc
    if tc >= 256:
        half = ((tc // 2) // 128) * 128
        if 128 <= half < tc:
            return tr, half
    if tr >= 2 * sub:
        half = ((tr // 2) // sub) * sub
        if sub <= half < tr:
            return half, tc
    return tr, tc  # too small to split legally; leave as one step


@partial(jax.jit, static_argnames=("target_block_bytes",))
def normalize(img, mean, std, *, target_block_bytes=2 * 1024 * 1024):
    """(img - mean[c]) / std[c] over an NCHW tensor, as a Pallas TPU kernel."""
    B, C, H, W = img.shape
    R, HW = B * C, H * W
    itemsize = img.dtype.itemsize

    # Tiny O(B*C) constant prep, kept in f32 (sub-f32 inputs avoid double
    # rounding; cast to the output dtype only happens on the store).
    # Note: reciprocal-multiply vs. divide differs by ~1 ulp (intentional).
    mean_f = mean.astype(jnp.float32)
    std_f = std.astype(jnp.float32)
    inv_std = 1.0 / std_f
    bias = -mean_f * inv_std
    row_scale = jnp.tile(inv_std, B).reshape(R, 1)
    row_bias = jnp.tile(bias, B).reshape(R, 1)

    # Lane-dense view: one row per (b, c) slab, H*W contiguous elements.
    x2 = img.reshape(R, HW)

    tr, tc = _choose_tiles(R, HW, itemsize, target_block_bytes)
    tr, tc = _maybe_split_for_megacore(tr, tc, R, HW, itemsize)
    grid = (pl.cdiv(R, tr), pl.cdiv(HW, tc))

    out2 = pl.pallas_call(
        _normalize_kernel,
        out_shape=jax.ShapeDtypeStruct((R, HW), img.dtype),
        grid_spec=pl.GridSpec(
            grid=grid,
            in_specs=[
                pl.BlockSpec((tr, 1), lambda i, j: (i, 0)),
                pl.BlockSpec((tr, 1), lambda i, j: (i, 0)),
                pl.BlockSpec((tr, tc), lambda i, j: (i, j)),
            ],
            out_specs=pl.BlockSpec((tr, tc), lambda i, j: (i, j)),
        ),
        compiler_params=pltpu.CompilerParams(
            dimension_semantics=("parallel", "parallel"),
        ),
        cost_estimate=pl.CostEstimate(
            flops=2 * R * HW,
            transcendentals=0,
            bytes_accessed=2 * R * HW * itemsize,
        ),
    )(row_scale, row_bias, x2)

    return out2.reshape(B, C, H, W)


if __name__ == "__main__":
    # Deterministic parameters (as in the PyTorch module __init__).
    mean = jnp.array([0.485, 0.456, 0.406], dtype=jnp.float32)
    std = jnp.array([0.229, 0.224, 0.225], dtype=jnp.float32)

    # Small example input consistent with a 3-channel image batch.
    key = jax.random.PRNGKey(0)
    img = jax.random.uniform(key, (2, 3, 16, 16), dtype=jnp.float32)

    out = normalize(img, mean, std)
    out = jax.block_until_ready(out)

    # Reference check against plain JAX broadcasting semantics.
    ref = (img - mean[None, :, None, None]) / std[None, :, None, None]
    assert out.shape == img.shape
    assert out.dtype == img.dtype
    # Reciprocal-multiply vs. divide differs by ~1 ulp; keep a sane tolerance.
    assert jnp.allclose(out, ref, atol=1e-6, rtol=1e-5)

    print("KERNEL_OK")
</pallas_src>

<mosaic_0001>
module attributes {stable_mosaic.version = 11 : i64} {
  func.func @_normalize_kernel(%arg0: i32, %arg1: i32, %arg2: memref<6x1xf32, #tpu.memory_space<vmem>>, %arg3: memref<6x1xf32, #tpu.memory_space<vmem>>, %arg4: memref<6x128xf32, #tpu.memory_space<vmem>>, %arg5: memref<6x128xf32, #tpu.memory_space<vmem>>) attributes {dimension_semantics = [#tpu.dimension_semantics<parallel>, #tpu.dimension_semantics<parallel>], iteration_bounds = array<i64: 1, 2>, scalar_prefetch = 0 : i64, scratch_operands = 0 : i64, tpu.core_type = #tpu.core_type<tc>, window_params = [{transform_indices = @transform_0, window_bounds = array<i64: 6, 1>}, {transform_indices = @transform_1, window_bounds = array<i64: 6, 1>}, {transform_indices = @transform_2, window_bounds = array<i64: 6, 128>}, {transform_indices = @transform_3, window_bounds = array<i64: 6, 128>}]} {
    %c0 = arith.constant 0 : index
    %c0_0 = arith.constant 0 : index
    %0 = vector.load %arg4[%c0, %c0_0] : memref<6x128xf32, #tpu.memory_space<vmem>>, vector<6x128xf32>
    %c0_1 = arith.constant 0 : index
    %c0_2 = arith.constant 0 : index
    %1 = vector.load %arg2[%c0_1, %c0_2] : memref<6x1xf32, #tpu.memory_space<vmem>>, vector<6x1xf32>
    %2 = vector.broadcast %1 : vector<6x1xf32> to vector<6x128xf32>
    %3 = arith.mulf %0, %2 : vector<6x128xf32>
    %c0_3 = arith.constant 0 : index
    %c0_4 = arith.constant 0 : index
    %4 = vector.load %arg3[%c0_3, %c0_4] : memref<6x1xf32, #tpu.memory_space<vmem>>, vector<6x1xf32>
    %5 = vector.broadcast %4 : vector<6x1xf32> to vector<6x128xf32>
    %6 = arith.addf %3, %5 : vector<6x128xf32>
    %c0_5 = arith.constant 0 : index
    %c0_6 = arith.constant 0 : index
    %7 = vector.load %arg5[%c0_5, %c0_6] : memref<6x128xf32, #tpu.memory_space<vmem>>, vector<6x128xf32>
    tpu.vector_store %arg5[%c0_5, %c0_6], %6 {strides = array<i32>} : memref<6x128xf32, #tpu.memory_space<vmem>>, vector<6x128xf32>,
    return
  }
  func.func @transform_0(%arg0: i32, %arg1: i32) -> (i32, i32) {
    %c0_i32 = arith.constant 0 : i32
    %c0_i32_0 = arith.constant 0 : i32
    return %arg0, %c0_i32 : i32, i32
  }
  func.func @transform_1(%arg0: i32, %arg1: i32) -> (i32, i32) {
    %c0_i32 = arith.constant 0 : i32
    %c0_i32_0 = arith.constant 0 : i32
    return %arg0, %c0_i32 : i32, i32
  }
  func.func @transform_2(%arg0: i32, %arg1: i32) -> (i32, i32) {
    %c0_i32 = arith.constant 0 : i32
    return %arg0, %arg1 : i32, i32
  }
  func.func @transform_3(%arg0: i32, %arg1: i32) -> (i32, i32) {
    %c0_i32 = arith.constant 0 : i32
    return %arg0, %arg1 : i32, i32
  }
}

</mosaic_0001>

<bundles_post_ra>
// kernel: tile.0
= control target key start
LH: loop header
LB: loop body
LE: loop exit
PB: predicated region body
PF: predicated region fallthrough
CT: control target
= control target key end

     0   :  { %vm7_vm0 = vcmask 7168   ;;  %s26_s10 = smov 126   ;;  %s49_s0 = inlined_call_operand.vmem [shape: f32[2,3], index: 0, kind: input, shape index: {}]   ;;  %s50_s1 = inlined_call_operand.vmem [shape: f32[6,1], index: 1, kind: output, shape index: {}]  }
   0x1   :  { %v4_v0 = vld [vmem:[%s49_s0] sm:$0x3]  ;;  %s25_s0 = smov 127  }
   0x2   :  { %5 = vst [vmem:[#allocation0] sm:$0x3] %v4_v0 }
   0x9   :  { %v9_v1 = vld [vmem:[#allocation0] sm:$0x3]  }
   0xa   :  { %v6_v2 = vld [vmem:[#allocation0] sm:$0x3]   ;;  %10 = vrot.lane.b32.xlu0 %v9_v1, %s25_s0 }
   0xb   :  { %8 = vst.msk [vmem:[%s50_s1] ss:$3 sm:$0x3] %vm7_vm0, %v6_v2   ;;  %v15_v3 = vld [vmem:[#allocation0] sm:$0x3]  }
   0xe   :  { %16 = vrot.lane.b32.xlu0 %v15_v3, %s26_s10 }
  0x7c   :  { %v11_v4 = vpop.permute.xlu0 %10  }
  0x7d   :  { %21 = vst.msk [vmem:[%s50_s1 + $0x1] ss:$3 sm:$0x3] %vm7_vm0, %v11_v4  }
  0x80   :  { %v17_v5 = vpop.permute.xlu0 %16  }
  0x81   :  { %22 = vst.msk [vmem:[%s50_s1 + $0x2] ss:$3 sm:$0x3] %vm7_vm0, %v17_v5  }

// kernel: tile.18
= control target key start
LH: loop header
LB: loop body
LE: loop exit
PB: predicated region body
PF: predicated region fallthrough
CT: control target
= control target key end

     0   :  { %s22_s0 = inlined_call_operand.vmem [shape: f32[3], index: 0, kind: input, shape index: {}]   ;;  %s23_s1 = inlined_call_operand.vmem [shape: f32[2,3], index: 1, kind: output, shape index: {}]  }
   0x1   :  { %v4_v0 = vld [vmem:[%s22_s0] ss:$0 sm:$0xff] }
   0x2   :  { %5 = vst [vmem:[%s23_s1] sm:$0x3] %v4_v0 }

// kernel: normalize.1
= control target key start
LH: loop header
LB: loop body
LE: loop exit
PB: predicated region body
PF: predicated region fallthrough
CT: control target
= control target key end

     0   :  { %s448_s12 = smov 0   ;;  %s450_s13 = smov 0   ;;  %s480_s0 = inlined_call_operand.vmem [shape: f32[6,1], index: 0, kind: input, shape index: {}]   ;;  %s481_s1 = inlined_call_operand.vmem [shape: f32[6,1], index: 1, kind: input, shape index: {}]   ;;  %s482_s2 = inlined_call_operand.vmem [shape: f32[6,256], index: 2, kind: input, shape index: {}]   ;;  %s483_s3 = inlined_call_operand.vmem [shape: f32[6,256], index: 3, kind: output, shape index: {}]  }
   0x1   :  { %s452_s14 = smov 0  }
   0x2 LB: > { %s22_s15 = sadd.s32 1, %s421_s13  ;;  %p372_p0 = scmp.ge.s32.totalorder %s425_s14, 1  ;;  %s425_s14 = sphi %s452_s14, %s13_s14   ;;  %s421_s13 = sphi %s450_s13, %s485_s13   ;;  %s417_s12 = sphi %s448_s12, %s484_s12  }
   0x3   : > { %p23_p1 = scmp.ge.s32.totalorder %s22_s15, 2  ;;  %p174_p2 = scmp.lt.s32.totalorder %s425_s14, 3 }
   0x5   : > { %s487_s15 = smov (%p23_p1, %s22_s15), 0  ;;  %p175_p3 = pnand %p372_p0, %p174_p2 }
   0x6   : > { %v237_v0 = vld [vmem:[%s480_s0] sm:$0x3f] (!%p175_p3)  ;;  %v427_v1 = vmov (!%p175_p3), 0   ;;  %p222_p4 = scmp.lt.s32.totalorder (!%p175_p3), %s417_s12, 1 }
   0x7   : > { %178 = sbr.rel (%p175_p3) target bundleno = 143 (0x8f), region = 32  ;;  %402 = vset.pattern.permute.xlu0 (!%p175_p3), %v427_v1  ;;  %v244_v2 = vld [vmem:[%s481_s1] sm:$0x3f] (!%p175_p3) }
   0x8   : > { %240 = vperm.xlu0 (!%p175_p3), %402, %v237_v0  }
   0xc   : > { %247 = vperm.xlu0 (!%p175_p3), %402, %v244_v2  }
   0xe   : > { %s489_s12 = smov (!%p222_p4, %s417_s12), 1 }
   0xf   : > { %s373_s20 = sshll.u32 %s489_s12, 3 }
  0x10   : > { %s227_s23 = scalar_lea.vmem %s482_s2, %s373_s20  ;;  %s235_s26 = scalar_lea.vmem %s483_s3, %s373_s20 }
  0x11   : > { %v236_v4 = vld [vmem:[%s227_s23] sm:$0x3f] }
  0x87   : > { %v241_v3 = vpop.permute.xlu0 %240 }
  0x88   : > { %v243_v5 = vmul.f32 %v241_v3, %v236_v4 }
  0x8b   : > { %v248_v6 = vpop.permute.xlu0 %247 }
  0x8c   : > { %v250_v7 = vadd.f32 %v248_v6, %v243_v5 }
  0x8e   : > { %251 = vst [vmem:[%s235_s26] sm:$0x3f] %v250_v7 }
  0x8f PF: > { %s13_s14 = sadd.s32 1, %s425_s14   ;;  %s484_s12 = smov %s421_s13 }
  0x90   : > { %p10_p5 = scmp.ge.s32.totalorder %s13_s14, 4   ;;  %s485_s13 = smov %s487_s15 }
  0x92   :  { %12 = sbr.rel (!%p10_p5) target bundleno = 2 (0x2), region = 68 }

</bundles_post_ra>
